<compile_context>
chip_gen: v7x
topology: tpu7x:2x2x1
jax: 0.10.0
libtpu: 0.0.40
codegen_flags: <defaults>
</compile_context>

<pallas_src>
import jax
import jax.numpy as jnp
from jax.experimental import pallas as pl
from jax.experimental.pallas import tpu as pltpu


def _round_up(n, m):
    return ((n + m - 1) // m) * m


def _mlp_kernel(x_ref,
                w1_ref, b1_ref,
                w2_ref, b2_ref,
                w3_ref, b3_ref,
                w4_ref, b4_ref,
                w5_ref, b5_ref,
                o_ref):
    # x arrives f32; cast to bf16 in-kernel (VPU work hidden under the MXU)
    # so the wrapper never writes a padded bf16 copy of the activations.
    x = x_ref[...].astype(jnp.bfloat16)

    h = jnp.dot(x, w1_ref[...],
                preferred_element_type=jnp.float32) + b1_ref[...]
    h = jnp.maximum(h, 0.0)

    h = jnp.dot(h.astype(jnp.bfloat16), w2_ref[...],
                preferred_element_type=jnp.float32) + b2_ref[...]
    h = jnp.maximum(h, 0.0)

    h = jnp.dot(h.astype(jnp.bfloat16), w3_ref[...],
                preferred_element_type=jnp.float32) + b3_ref[...]
    h = jnp.maximum(h, 0.0)

    h = jnp.dot(h.astype(jnp.bfloat16), w4_ref[...],
                preferred_element_type=jnp.float32) + b4_ref[...]
    h = jnp.maximum(h, 0.0)

    out = jnp.dot(h.astype(jnp.bfloat16), w5_ref[...],
                  preferred_element_type=jnp.float32) + b5_ref[...]
    o_ref[...] = out.astype(o_ref.dtype)


def prepare_encoder_params(params):
    """Pad + cast weights/biases ONCE (hoisted out of the per-call hot path).

    params: dict of W{i}: (in, out) and b{i}: (1, out), float32.
    Note: PyTorch nn.Linear stores weight as (out, in); transpose before use.
    """
    x_dim, H = params["w1"].shape
    h_dim = params["w5"].shape[1]
    # Pad only to the next multiple of 128 (lane / MXU-N alignment). Padding
    # further (e.g. to 256) would just double padded FLOPs for no gain.
    Hp = _round_up(H, 128)
    out_pad = _round_up(h_dim, 128)

    def pad2(a, rows, cols):
        return jnp.pad(a, ((0, rows - a.shape[0]), (0, cols - a.shape[1])))

    f32, bf16 = jnp.float32, jnp.bfloat16
    return {
        "x_dim": x_dim, "H": H, "h_dim": h_dim, "Hp": Hp, "out_pad": out_pad,
        "w1": pad2(params["w1"], x_dim, Hp).astype(bf16),
        "w2": pad2(params["w2"], Hp, Hp).astype(bf16),
        "w3": pad2(params["w3"], Hp, Hp).astype(bf16),
        "w4": pad2(params["w4"], Hp, Hp).astype(bf16),
        "w5": pad2(params["w5"], Hp, out_pad).astype(bf16),
        "b1": pad2(params["b1"], 1, Hp).astype(f32),
        "b2": pad2(params["b2"], 1, Hp).astype(f32),
        "b3": pad2(params["b3"], 1, Hp).astype(f32),
        "b4": pad2(params["b4"], 1, Hp).astype(f32),
        "b5": pad2(params["b5"], 1, out_pad).astype(f32),
    }


def _choose_tile_b(B):
    if B >= 1024:
        # Big batches: 512-row tiles amortize the ~0.35us/step grid overhead
        # (weights are VMEM-resident, per-step HBM traffic is just x/out tiles).
        return 512
    if B >= 64:
        # Guarantee >=2 grid steps so both v7x TensorCores get a batch slice.
        return min(256, _round_up(pl.cdiv(B, 2), 16))
    # bf16 packs 16 rows per sublane group -> round tiny batches to 16.
    return _round_up(max(B, 1), 16)


def mixture_gaussian_encoder(x, prep, tile_b=None):
    """Forward pass of Mixture_Gaussian_encoder via a single Pallas kernel.

    x:    (B, x_dim) float32
    prep: output of prepare_encoder_params
    returns: (B, h_dim) float32
    """
    B, x_dim = x.shape
    assert x_dim == prep["x_dim"]
    Hp, out_pad, h_dim = prep["Hp"], prep["out_pad"], prep["h_dim"]

    if tile_b is None:
        tile_b = _choose_tile_b(B)
    Bp = _round_up(B, tile_b)
    num_tiles = Bp // tile_b

    # Pad the batch only when needed; x stays f32 (cast to bf16 in-kernel).
    xp = x if Bp == B else jnp.pad(x, ((0, Bp - B), (0, 0)))

    wb_names = ["w1", "b1", "w2", "b2", "w3", "b3", "w4", "b4", "w5", "b5"]
    wb_ops = [prep[n] for n in wb_names]
    operands = [xp] + wb_ops

    flops = 2 * Bp * (x_dim * Hp + 3 * Hp * Hp + Hp * out_pad)
    bytes_accessed = int(xp.size * xp.dtype.itemsize
                         + sum(o.size * o.dtype.itemsize for o in wb_ops)
                         + Bp * out_pad * 4)
    out_shape = jax.ShapeDtypeStruct((Bp, out_pad), jnp.float32)

    # TODO(synk): for very large H (resident bf16 weights approaching
    # ~40-48 MiB) tile the hidden/N dimension per layer instead of keeping all
    # 5 weight matrices VMEM-resident -- required to fit v7x's 64 MiB VMEM.

    def build_and_call(single_buffer_weights):
        def const_spec(shape):
            # Weights/biases never change across the grid (constant index_map):
            # single-buffer them so their VMEM footprint isn't doubled.
            if single_buffer_weights:
                return pl.BlockSpec(shape, lambda i: (0, 0),
                                    pipeline_mode=pl.Buffered(1))
            return pl.BlockSpec(shape, lambda i: (0, 0))

        x_spec = pl.BlockSpec((tile_b, x_dim), lambda i: (i, 0))
        in_specs = [x_spec] + [const_spec(o.shape) for o in wb_ops]
        out_spec = pl.BlockSpec((tile_b, out_pad), lambda i: (i, 0))

        wb_bufs = 1 if single_buffer_weights else 2
        vmem_need = (wb_bufs * sum(o.size * o.dtype.itemsize for o in wb_ops)
                     + 2 * (tile_b * x_dim * xp.dtype.itemsize
                            + tile_b * out_pad * 4)
                     + tile_b * Hp * 6 + tile_b * out_pad * 4)
        vmem_limit = int(min(max(2 * vmem_need, 32 * 2**20), 64 * 2**20))

        return pl.pallas_call(
            _mlp_kernel,
            out_shape=out_shape,
            grid=(num_tiles,),
            in_specs=in_specs,
            out_specs=out_spec,
            compiler_params=pltpu.CompilerParams(
                dimension_semantics=("parallel",),
                vmem_limit_bytes=vmem_limit),
            cost_estimate=pl.CostEstimate(
                flops=flops, transcendentals=0,
                bytes_accessed=bytes_accessed),
        )(*operands)

    try:
        out = build_and_call(single_buffer_weights=True)
        out = jax.block_until_ready(out)
    except Exception:
        # pipeline_mode=pl.Buffered(1) not accepted on this jax version: fall
        # back to default double-buffered weight specs (identical results).
        out = build_and_call(single_buffer_weights=False)

    return out[:B, :h_dim]


def init_params(key, x_dim, H, h_dim):
    """Deterministic synthetic init matching the PyTorch module's shapes.

    Weights are stored (in, out); PyTorch nn.Linear weights ((out, in)) would
    need a transpose before being loaded here.
    """
    dims = [(x_dim, H), (H, H), (H, H), (H, H), (H, h_dim)]
    params = {}
    for i, (din, dout) in enumerate(dims, start=1):
        key, kw, kb = jax.random.split(key, 3)
        scale = 1.0 / jnp.sqrt(jnp.float32(din))
        params[f"w{i}"] = jax.random.uniform(
            kw, (din, dout), jnp.float32, -scale, scale)
        params[f"b{i}"] = jax.random.uniform(
            kb, (1, dout), jnp.float32, -scale, scale)
    return params


def reference_forward(x, params):
    h = x
    for i in range(1, 5):
        h = jnp.maximum(h @ params[f"w{i}"] + params[f"b{i}"], 0.0)
    return h @ params["w5"] + params["b5"]


if __name__ == "__main__":
    # Small shapes consistent with the module: params = {x_dim, H_dim, h_dim}.
    B, x_dim, H, h_dim = 8, 32, 64, 16

    key = jax.random.PRNGKey(0)
    key, kx = jax.random.split(key)
    x = jax.random.normal(kx, (B, x_dim), jnp.float32)

    params = init_params(key, x_dim, H, h_dim)
    prep = prepare_encoder_params(params)   # pad/cast once, outside hot path

    out = mixture_gaussian_encoder(x, prep)
    out = jax.block_until_ready(out)

    ref = reference_forward(x, params)
    assert out.shape == (B, h_dim)
    # bf16 matmul inputs with f32 accumulation: loosen tolerance vs f32 ref.
    err = float(jnp.max(jnp.abs(out - ref)))
    assert jnp.allclose(out, ref, atol=5e-2, rtol=5e-2), err

    print("KERNEL_OK")
</pallas_src>

<mosaic_0001>
module attributes {stable_mosaic.version = 11 : i64} {
  func.func @_mlp_kernel(%arg0: i32, %arg1: memref<16x32xf32, #tpu.memory_space<vmem>>, %arg2: memref<32x128xbf16, #tpu.memory_space<vmem>>, %arg3: memref<1x128xf32, #tpu.memory_space<vmem>>, %arg4: memref<128x128xbf16, #tpu.memory_space<vmem>>, %arg5: memref<1x128xf32, #tpu.memory_space<vmem>>, %arg6: memref<128x128xbf16, #tpu.memory_space<vmem>>, %arg7: memref<1x128xf32, #tpu.memory_space<vmem>>, %arg8: memref<128x128xbf16, #tpu.memory_space<vmem>>, %arg9: memref<1x128xf32, #tpu.memory_space<vmem>>, %arg10: memref<128x128xbf16, #tpu.memory_space<vmem>>, %arg11: memref<1x128xf32, #tpu.memory_space<vmem>>, %arg12: memref<16x128xf32, #tpu.memory_space<vmem>>) attributes {dimension_semantics = [#tpu.dimension_semantics<parallel>], iteration_bounds = array<i64: 1>, scalar_prefetch = 0 : i64, scratch_operands = 0 : i64, tpu.core_type = #tpu.core_type<tc>, window_params = [{transform_indices = @transform_0, window_bounds = array<i64: 16, 32>}, {pipeline_mode = #tpu.pipeline_mode<synchronous>, transform_indices = @transform_1, window_bounds = array<i64: 32, 128>}, {pipeline_mode = #tpu.pipeline_mode<synchronous>, transform_indices = @transform_2, window_bounds = array<i64: 1, 128>}, {pipeline_mode = #tpu.pipeline_mode<synchronous>, transform_indices = @transform_3, window_bounds = array<i64: 128, 128>}, {pipeline_mode = #tpu.pipeline_mode<synchronous>, transform_indices = @transform_4, window_bounds = array<i64: 1, 128>}, {pipeline_mode = #tpu.pipeline_mode<synchronous>, transform_indices = @transform_5, window_bounds = array<i64: 128, 128>}, {pipeline_mode = #tpu.pipeline_mode<synchronous>, transform_indices = @transform_6, window_bounds = array<i64: 1, 128>}, {pipeline_mode = #tpu.pipeline_mode<synchronous>, transform_indices = @transform_7, window_bounds = array<i64: 128, 128>}, {pipeline_mode = #tpu.pipeline_mode<synchronous>, transform_indices = @transform_8, window_bounds = array<i64: 1, 128>}, {pipeline_mode = #tpu.pipeline_mode<synchronous>, transform_indices = @transform_9, window_bounds = array<i64: 128, 128>}, {pipeline_mode = #tpu.pipeline_mode<synchronous>, transform_indices = @transform_10, window_bounds = array<i64: 1, 128>}, {transform_indices = @transform_11, window_bounds = array<i64: 16, 128>}]} {
    %c0 = arith.constant 0 : index
    %c0_0 = arith.constant 0 : index
    %0 = vector.load %arg1[%c0, %c0_0] : memref<16x32xf32, #tpu.memory_space<vmem>>, vector<16x32xf32>
    %1 = arith.truncf %0 : vector<16x32xf32> to vector<16x32xbf16>
    %c0_1 = arith.constant 0 : index
    %c0_2 = arith.constant 0 : index
    %2 = vector.load %arg2[%c0_1, %c0_2] : memref<32x128xbf16, #tpu.memory_space<vmem>>, vector<32x128xbf16>
    %cst = arith.constant dense<0.000000e+00> : vector<16x128xf32>
    %3 = tpu.matmul %1, %2, %cst {dimension_numbers = #tpu.dot_dimension_numbers<[1], [0], [0], [1], [0, 0, 1, 1], [], []>} : vector<16x32xbf16>, vector<32x128xbf16>, vector<16x128xf32> -> vector<16x128xf32>
    %c0_3 = arith.constant 0 : index
    %c0_4 = arith.constant 0 : index
    %4 = vector.load %arg3[%c0_3, %c0_4] : memref<1x128xf32, #tpu.memory_space<vmem>>, vector<1x128xf32>
    %5 = vector.broadcast %4 : vector<1x128xf32> to vector<16x128xf32>
    %6 = arith.addf %3, %5 : vector<16x128xf32>
    %cst_5 = arith.constant 0.000000e+00 : f32
    %7 = vector.broadcast %cst_5 : f32 to vector<16x128xf32>
    %8 = arith.maximumf %6, %7 : vector<16x128xf32>
    %9 = arith.truncf %8 : vector<16x128xf32> to vector<16x128xbf16>
    %c0_6 = arith.constant 0 : index
    %c0_7 = arith.constant 0 : index
    %10 = vector.load %arg4[%c0_6, %c0_7] : memref<128x128xbf16, #tpu.memory_space<vmem>>, vector<128x128xbf16>
    %cst_8 = arith.constant dense<0.000000e+00> : vector<16x128xf32>
    %11 = tpu.matmul %9, %10, %cst_8 {dimension_numbers = #tpu.dot_dimension_numbers<[1], [0], [0], [1], [0, 0, 1, 1], [], []>} : vector<16x128xbf16>, vector<128x128xbf16>, vector<16x128xf32> -> vector<16x128xf32>
    %c0_9 = arith.constant 0 : index
    %c0_10 = arith.constant 0 : index
    %12 = vector.load %arg5[%c0_9, %c0_10] : memref<1x128xf32, #tpu.memory_space<vmem>>, vector<1x128xf32>
    %13 = vector.broadcast %12 : vector<1x128xf32> to vector<16x128xf32>
    %14 = arith.addf %11, %13 : vector<16x128xf32>
    %cst_11 = arith.constant 0.000000e+00 : f32
    %15 = vector.broadcast %cst_11 : f32 to vector<16x128xf32>
    %16 = arith.maximumf %14, %15 : vector<16x128xf32>
    %17 = arith.truncf %16 : vector<16x128xf32> to vector<16x128xbf16>
    %c0_12 = arith.constant 0 : index
    %c0_13 = arith.constant 0 : index
    %18 = vector.load %arg6[%c0_12, %c0_13] : memref<128x128xbf16, #tpu.memory_space<vmem>>, vector<128x128xbf16>
    %cst_14 = arith.constant dense<0.000000e+00> : vector<16x128xf32>
    %19 = tpu.matmul %17, %18, %cst_14 {dimension_numbers = #tpu.dot_dimension_numbers<[1], [0], [0], [1], [0, 0, 1, 1], [], []>} : vector<16x128xbf16>, vector<128x128xbf16>, vector<16x128xf32> -> vector<16x128xf32>
    %c0_15 = arith.constant 0 : index
    %c0_16 = arith.constant 0 : index
    %20 = vector.load %arg7[%c0_15, %c0_16] : memref<1x128xf32, #tpu.memory_space<vmem>>, vector<1x128xf32>
    %21 = vector.broadcast %20 : vector<1x128xf32> to vector<16x128xf32>
    %22 = arith.addf %19, %21 : vector<16x128xf32>
    %cst_17 = arith.constant 0.000000e+00 : f32
    %23 = vector.broadcast %cst_17 : f32 to vector<16x128xf32>
    %24 = arith.maximumf %22, %23 : vector<16x128xf32>
    %25 = arith.truncf %24 : vector<16x128xf32> to vector<16x128xbf16>
    %c0_18 = arith.constant 0 : index
    %c0_19 = arith.constant 0 : index
    %26 = vector.load %arg8[%c0_18, %c0_19] : memref<128x128xbf16, #tpu.memory_space<vmem>>, vector<128x128xbf16>
    %cst_20 = arith.constant dense<0.000000e+00> : vector<16x128xf32>
    %27 = tpu.matmul %25, %26, %cst_20 {dimension_numbers = #tpu.dot_dimension_numbers<[1], [0], [0], [1], [0, 0, 1, 1], [], []>} : vector<16x128xbf16>, vector<128x128xbf16>, vector<16x128xf32> -> vector<16x128xf32>
    %c0_21 = arith.constant 0 : index
    %c0_22 = arith.constant 0 : index
    %28 = vector.load %arg9[%c0_21, %c0_22] : memref<1x128xf32, #tpu.memory_space<vmem>>, vector<1x128xf32>
    %29 = vector.broadcast %28 : vector<1x128xf32> to vector<16x128xf32>
    %30 = arith.addf %27, %29 : vector<16x128xf32>
    %cst_23 = arith.constant 0.000000e+00 : f32
    %31 = vector.broadcast %cst_23 : f32 to vector<16x128xf32>
    %32 = arith.maximumf %30, %31 : vector<16x128xf32>
    %33 = arith.truncf %32 : vector<16x128xf32> to vector<16x128xbf16>
    %c0_24 = arith.constant 0 : index
    %c0_25 = arith.constant 0 : index
    %34 = vector.load %arg10[%c0_24, %c0_25] : memref<128x128xbf16, #tpu.memory_space<vmem>>, vector<128x128xbf16>
    %cst_26 = arith.constant dense<0.000000e+00> : vector<16x128xf32>
    %35 = tpu.matmul %33, %34, %cst_26 {dimension_numbers = #tpu.dot_dimension_numbers<[1], [0], [0], [1], [0, 0, 1, 1], [], []>} : vector<16x128xbf16>, vector<128x128xbf16>, vector<16x128xf32> -> vector<16x128xf32>
    %c0_27 = arith.constant 0 : index
    %c0_28 = arith.constant 0 : index
    %36 = vector.load %arg11[%c0_27, %c0_28] : memref<1x128xf32, #tpu.memory_space<vmem>>, vector<1x128xf32>
    %37 = vector.broadcast %36 : vector<1x128xf32> to vector<16x128xf32>
    %38 = arith.addf %35, %37 : vector<16x128xf32>
    %c0_29 = arith.constant 0 : index
    %c0_30 = arith.constant 0 : index
    %39 = vector.load %arg12[%c0_29, %c0_30] : memref<16x128xf32, #tpu.memory_space<vmem>>, vector<16x128xf32>
    tpu.vector_store %arg12[%c0_29, %c0_30], %38 {strides = array<i32>} : memref<16x128xf32, #tpu.memory_space<vmem>>, vector<16x128xf32>,
    return
  }
  func.func @transform_0(%arg0: i32) -> (i32, i32) {
    %c0_i32 = arith.constant 0 : i32
    %c0_i32_0 = arith.constant 0 : i32
    return %arg0, %c0_i32 : i32, i32
  }
  func.func @transform_1(%arg0: i32) -> (i32, i32) {
    %c0_i32 = arith.constant 0 : i32
    %c0_i32_0 = arith.constant 0 : i32
    %c0_i32_1 = arith.constant 0 : i32
    return %c0_i32, %c0_i32_0 : i32, i32
  }
  func.func @transform_2(%arg0: i32) -> (i32, i32) {
    %c0_i32 = arith.constant 0 : i32
    %c0_i32_0 = arith.constant 0 : i32
    %c0_i32_1 = arith.constant 0 : i32
    return %c0_i32, %c0_i32_0 : i32, i32
  }
  func.func @transform_3(%arg0: i32) -> (i32, i32) {
    %c0_i32 = arith.constant 0 : i32
    %c0_i32_0 = arith.constant 0 : i32
    %c0_i32_1 = arith.constant 0 : i32
    return %c0_i32, %c0_i32_0 : i32, i32
  }
  func.func @transform_4(%arg0: i32) -> (i32, i32) {
    %c0_i32 = arith.constant 0 : i32
    %c0_i32_0 = arith.constant 0 : i32
    %c0_i32_1 = arith.constant 0 : i32
    return %c0_i32, %c0_i32_0 : i32, i32
  }
  func.func @transform_5(%arg0: i32) -> (i32, i32) {
    %c0_i32 = arith.constant 0 : i32
    %c0_i32_0 = arith.constant 0 : i32
    %c0_i32_1 = arith.constant 0 : i32
    return %c0_i32, %c0_i32_0 : i32, i32
  }
  func.func @transform_6(%arg0: i32) -> (i32, i32) {
    %c0_i32 = arith.constant 0 : i32
    %c0_i32_0 = arith.constant 0 : i32
    %c0_i32_1 = arith.constant 0 : i32
    return %c0_i32, %c0_i32_0 : i32, i32
  }
  func.func @transform_7(%arg0: i32) -> (i32, i32) {
    %c0_i32 = arith.constant 0 : i32
    %c0_i32_0 = arith.constant 0 : i32
    %c0_i32_1 = arith.constant 0 : i32
    return %c0_i32, %c0_i32_0 : i32, i32
  }
  func.func @transform_8(%arg0: i32) -> (i32, i32) {
    %c0_i32 = arith.constant 0 : i32
    %c0_i32_0 = arith.constant 0 : i32
    %c0_i32_1 = arith.constant 0 : i32
    return %c0_i32, %c0_i32_0 : i32, i32
  }
  func.func @transform_9(%arg0: i32) -> (i32, i32) {
    %c0_i32 = arith.constant 0 : i32
    %c0_i32_0 = arith.constant 0 : i32
    %c0_i32_1 = arith.constant 0 : i32
    return %c0_i32, %c0_i32_0 : i32, i32
  }
  func.func @transform_10(%arg0: i32) -> (i32, i32) {
    %c0_i32 = arith.constant 0 : i32
    %c0_i32_0 = arith.constant 0 : i32
    %c0_i32_1 = arith.constant 0 : i32
    return %c0_i32, %c0_i32_0 : i32, i32
  }
  func.func @transform_11(%arg0: i32) -> (i32, i32) {
    %c0_i32 = arith.constant 0 : i32
    %c0_i32_0 = arith.constant 0 : i32
    return %arg0, %c0_i32 : i32, i32
  }
}

module attributes {stable_mosaic.version = 11 : i64} {
  func.func @_mlp_kernel(%arg0: i32, %arg1: memref<16x32xf32, #tpu.memory_space<vmem>>, %arg2: memref<32x128xbf16, #tpu.memory_space<vmem>>, %arg3: memref<1x128xf32, #tpu.memory_space<vmem>>, %arg4: memref<128x128xbf16, #tpu.memory_space<vmem>>, %arg5: memref<1x128xf32, #tpu.memory_space<vmem>>, %arg6: memref<128x128xbf16, #tpu.memory_space<vmem>>, %arg7: memref<1x128xf32, #tpu.memory_space<vmem>>, %arg8: memref<128x128xbf16, #tpu.memory_space<vmem>>, %arg9: memref<1x128xf32, #tpu.memory_space<vmem>>, %arg10: memref<128x128xbf16, #tpu.memory_space<vmem>>, %arg11: memref<1x128xf32, #tpu.memory_space<vmem>>, %arg12: memref<16x128xf32, #tpu.memory_space<vmem>>) attributes {dimension_semantics = [#tpu.dimension_semantics<parallel>], iteration_bounds = array<i64: 1>, scalar_prefetch = 0 : i64, scratch_operands = 0 : i64, tpu.core_type = #tpu.core_type<tc>, window_params = [{transform_indices = @transform_0, window_bounds = array<i64: 16, 32>}, {pipeline_mode = #tpu.pipeline_mode<synchronous>, transform_indices = @transform_1, window_bounds = array<i64: 32, 128>}, {pipeline_mode = #tpu.pipeline_mode<synchronous>, transform_indices = @transform_2, window_bounds = array<i64: 1, 128>}, {pipeline_mode = #tpu.pipeline_mode<synchronous>, transform_indices = @transform_3, window_bounds = array<i64: 128, 128>}, {pipeline_mode = #tpu.pipeline_mode<synchronous>, transform_indices = @transform_4, window_bounds = array<i64: 1, 128>}, {pipeline_mode = #tpu.pipeline_mode<synchronous>, transform_indices = @transform_5, window_bounds = array<i64: 128, 128>}, {pipeline_mode = #tpu.pipeline_mode<synchronous>, transform_indices = @transform_6, window_bounds = array<i64: 1, 128>}, {pipeline_mode = #tpu.pipeline_mode<synchronous>, transform_indices = @transform_7, window_bounds = array<i64: 128, 128>}, {pipeline_mode = #tpu.pipeline_mode<synchronous>, transform_indices = @transform_8, window_bounds = array<i64: 1, 128>}, {pipeline_mode = #tpu.pipeline_mode<synchronous>, transform_indices = @transform_9, window_bounds = array<i64: 128, 128>}, {pipeline_mode = #tpu.pipeline_mode<synchronous>, transform_indices = @transform_10, window_bounds = array<i64: 1, 128>}, {transform_indices = @transform_11, window_bounds = array<i64: 16, 128>}]} {
    %c0 = arith.constant 0 : index
    %c0_0 = arith.constant 0 : index
    %0 = vector.load %arg1[%c0, %c0_0] : memref<16x32xf32, #tpu.memory_space<vmem>>, vector<16x32xf32>
    %1 = arith.truncf %0 : vector<16x32xf32> to vector<16x32xbf16>
    %c0_1 = arith.constant 0 : index
    %c0_2 = arith.constant 0 : index
    %2 = vector.load %arg2[%c0_1, %c0_2] : memref<32x128xbf16, #tpu.memory_space<vmem>>, vector<32x128xbf16>
    %cst = arith.constant dense<0.000000e+00> : vector<16x128xf32>
    %3 = tpu.matmul %1, %2, %cst {dimension_numbers = #tpu.dot_dimension_numbers<[1], [0], [0], [1], [0, 0, 1, 1], [], []>} : vector<16x32xbf16>, vector<32x128xbf16>, vector<16x128xf32> -> vector<16x128xf32>
    %c0_3 = arith.constant 0 : index
    %c0_4 = arith.constant 0 : index
    %4 = vector.load %arg3[%c0_3, %c0_4] : memref<1x128xf32, #tpu.memory_space<vmem>>, vector<1x128xf32>
    %5 = vector.broadcast %4 : vector<1x128xf32> to vector<16x128xf32>
    %6 = arith.addf %3, %5 : vector<16x128xf32>
    %cst_5 = arith.constant 0.000000e+00 : f32
    %7 = vector.broadcast %cst_5 : f32 to vector<16x128xf32>
    %8 = arith.maximumf %6, %7 : vector<16x128xf32>
    %9 = arith.truncf %8 : vector<16x128xf32> to vector<16x128xbf16>
    %c0_6 = arith.constant 0 : index
    %c0_7 = arith.constant 0 : index
    %10 = vector.load %arg4[%c0_6, %c0_7] : memref<128x128xbf16, #tpu.memory_space<vmem>>, vector<128x128xbf16>
    %cst_8 = arith.constant dense<0.000000e+00> : vector<16x128xf32>
    %11 = tpu.matmul %9, %10, %cst_8 {dimension_numbers = #tpu.dot_dimension_numbers<[1], [0], [0], [1], [0, 0, 1, 1], [], []>} : vector<16x128xbf16>, vector<128x128xbf16>, vector<16x128xf32> -> vector<16x128xf32>
    %c0_9 = arith.constant 0 : index
    %c0_10 = arith.constant 0 : index
    %12 = vector.load %arg5[%c0_9, %c0_10] : memref<1x128xf32, #tpu.memory_space<vmem>>, vector<1x128xf32>
    %13 = vector.broadcast %12 : vector<1x128xf32> to vector<16x128xf32>
    %14 = arith.addf %11, %13 : vector<16x128xf32>
    %cst_11 = arith.constant 0.000000e+00 : f32
    %15 = vector.broadcast %cst_11 : f32 to vector<16x128xf32>
    %16 = arith.maximumf %14, %15 : vector<16x128xf32>
    %17 = arith.truncf %16 : vector<16x128xf32> to vector<16x128xbf16>
    %c0_12 = arith.constant 0 : index
    %c0_13 = arith.constant 0 : index
    %18 = vector.load %arg6[%c0_12, %c0_13] : memref<128x128xbf16, #tpu.memory_space<vmem>>, vector<128x128xbf16>
    %cst_14 = arith.constant dense<0.000000e+00> : vector<16x128xf32>
    %19 = tpu.matmul %17, %18, %cst_14 {dimension_numbers = #tpu.dot_dimension_numbers<[1], [0], [0], [1], [0, 0, 1, 1], [], []>} : vector<16x128xbf16>, vector<128x128xbf16>, vector<16x128xf32> -> vector<16x128xf32>
    %c0_15 = arith.constant 0 : index
    %c0_16 = arith.constant 0 : index
    %20 = vector.load %arg7[%c0_15, %c0_16] : memref<1x128xf32, #tpu.memory_space<vmem>>, vector<1x128xf32>
    %21 = vector.broadcast %20 : vector<1x128xf32> to vector<16x128xf32>
    %22 = arith.addf %19, %21 : vector<16x128xf32>
    %cst_17 = arith.constant 0.000000e+00 : f32
    %23 = vector.broadcast %cst_17 : f32 to vector<16x128xf32>
    %24 = arith.maximumf %22, %23 : vector<16x128xf32>
    %25 = arith.truncf %24 : vector<16x128xf32> to vector<16x128xbf16>
    %c0_18 = arith.constant 0 : index
    %c0_19 = arith.constant 0 : index
    %26 = vector.load %arg8[%c0_18, %c0_19] : memref<128x128xbf16, #tpu.memory_space<vmem>>, vector<128x128xbf16>
    %cst_20 = arith.constant dense<0.000000e+00> : vector<16x128xf32>
    %27 = tpu.matmul %25, %26, %cst_20 {dimension_numbers = #tpu.dot_dimension_numbers<[1], [0], [0], [1], [0, 0, 1, 1], [], []>} : vector<16x128xbf16>, vector<128x128xbf16>, vector<16x128xf32> -> vector<16x128xf32>
    %c0_21 = arith.constant 0 : index
    %c0_22 = arith.constant 0 : index
    %28 = vector.load %arg9[%c0_21, %c0_22] : memref<1x128xf32, #tpu.memory_space<vmem>>, vector<1x128xf32>
    %29 = vector.broadcast %28 : vector<1x128xf32> to vector<16x128xf32>
    %30 = arith.addf %27, %29 : vector<16x128xf32>
    %cst_23 = arith.constant 0.000000e+00 : f32
    %31 = vector.broadcast %cst_23 : f32 to vector<16x128xf32>
    %32 = arith.maximumf %30, %31 : vector<16x128xf32>
    %33 = arith.truncf %32 : vector<16x128xf32> to vector<16x128xbf16>
    %c0_24 = arith.constant 0 : index
    %c0_25 = arith.constant 0 : index
    %34 = vector.load %arg10[%c0_24, %c0_25] : memref<128x128xbf16, #tpu.memory_space<vmem>>, vector<128x128xbf16>
    %cst_26 = arith.constant dense<0.000000e+00> : vector<16x128xf32>
    %35 = tpu.matmul %33, %34, %cst_26 {dimension_numbers = #tpu.dot_dimension_numbers<[1], [0], [0], [1], [0, 0, 1, 1], [], []>} : vector<16x128xbf16>, vector<128x128xbf16>, vector<16x128xf32> -> vector<16x128xf32>
    %c0_27 = arith.constant 0 : index
    %c0_28 = arith.constant 0 : index
    %36 = vector.load %arg11[%c0_27, %c0_28] : memref<1x128xf32, #tpu.memory_space<vmem>>, vector<1x128xf32>
    %37 = vector.broadcast %36 : vector<1x128xf32> to vector<16x128xf32>
    %38 = arith.addf %35, %37 : vector<16x128xf32>
    %c0_29 = arith.constant 0 : index
    %c0_30 = arith.constant 0 : index
    %39 = vector.load %arg12[%c0_29, %c0_30] : memref<16x128xf32, #tpu.memory_space<vmem>>, vector<16x128xf32>
    tpu.vector_store %arg12[%c0_29, %c0_30], %38 {strides = array<i32>} : memref<16x128xf32, #tpu.memory_space<vmem>>, vector<16x128xf32>,
    return
  }
  func.func @transform_0(%arg0: i32) -> (i32, i32) {
    %c0_i32 = arith.constant 0 : i32
    %c0_i32_0 = arith.constant 0 : i32
    return %arg0, %c0_i32 : i32, i32
  }
  func.func @transform_1(%arg0: i32) -> (i32, i32) {
    %c0_i32 = arith.constant 0 : i32
    %c0_i32_0 = arith.constant 0 : i32
    %c0_i32_1 = arith.constant 0 : i32
    return %c0_i32, %c0_i32_0 : i32, i32
  }
  func.func @transform_2(%arg0: i32) -> (i32, i32) {
    %c0_i32 = arith.constant 0 : i32
    %c0_i32_0 = arith.constant 0 : i32
    %c0_i32_1 = arith.constant 0 : i32
    return %c0_i32, %c0_i32_0 : i32, i32
  }
  func.func @transform_3(%arg0: i32) -> (i32, i32) {
    %c0_i32 = arith.constant 0 : i32
    %c0_i32_0 = arith.constant 0 : i32
    %c0_i32_1 = arith.constant 0 : i32
    return %c0_i32, %c0_i32_0 : i32, i32
  }
  func.func @transform_4(%arg0: i32) -> (i32, i32) {
    %c0_i32 = arith.constant 0 : i32
    %c0_i32_0 = arith.constant 0 : i32
    %c0_i32_1 = arith.constant 0 : i32
    return %c0_i32, %c0_i32_0 : i32, i32
  }
  func.func @transform_5(%arg0: i32) -> (i32, i32) {
    %c0_i32 = arith.constant 0 : i32
    %c0_i32_0 = arith.constant 0 : i32
    %c0_i32_1 = arith.constant 0 : i32
    return %c0_i32, %c0_i32_0 : i32, i32
  }
  func.func @transform_6(%arg0: i32) -> (i32, i32) {
    %c0_i32 = arith.constant 0 : i32
    %c0_i32_0 = arith.constant 0 : i32
    %c0_i32_1 = arith.constant 0 : i32
    return %c0_i32, %c0_i32_0 : i32, i32
  }
  func.func @transform_7(%arg0: i32) -> (i32, i32) {
    %c0_i32 = arith.constant 0 : i32
    %c0_i32_0 = arith.constant 0 : i32
    %c0_i32_1 = arith.constant 0 : i32
    return %c0_i32, %c0_i32_0 : i32, i32
  }
  func.func @transform_8(%arg0: i32) -> (i32, i32) {
    %c0_i32 = arith.constant 0 : i32
    %c0_i32_0 = arith.constant 0 : i32
    %c0_i32_1 = arith.constant 0 : i32
    return %c0_i32, %c0_i32_0 : i32, i32
  }
  func.func @transform_9(%arg0: i32) -> (i32, i32) {
    %c0_i32 = arith.constant 0 : i32
    %c0_i32_0 = arith.constant 0 : i32
    %c0_i32_1 = arith.constant 0 : i32
    return %c0_i32, %c0_i32_0 : i32, i32
  }
  func.func @transform_10(%arg0: i32) -> (i32, i32) {
    %c0_i32 = arith.constant 0 : i32
    %c0_i32_0 = arith.constant 0 : i32
    %c0_i32_1 = arith.constant 0 : i32
    return %c0_i32, %c0_i32_0 : i32, i32
  }
  func.func @transform_11(%arg0: i32) -> (i32, i32) {
    %c0_i32 = arith.constant 0 : i32
    %c0_i32_0 = arith.constant 0 : i32
    return %arg0, %c0_i32 : i32, i32
  }
}

</mosaic_0001>

<bundles_post_ra>
// kernel: tpu_custom_call.1
= control target key start
LH: loop header
LB: loop body
LE: loop exit
PB: predicated region body
PF: predicated region fallthrough
CT: control target
= control target key end

     0   :  { %16 = vsyncpa [#allocation3], 0  ;;  %s1290_s0 = inlined_call_operand.hbm [shape: f32[16,32], index: 0, kind: input, shape index: {}]   ;;  %s1291_s1 = inlined_call_operand.hbm [shape: bf16[32,128], index: 1, kind: input, shape index: {}]   ;;  %s1292_s2 = inlined_call_operand.vmem [shape: f32[1,128], index: 2, kind: input, shape index: {}]   ;;  %s1293_s3 = inlined_call_operand.hbm [shape: bf16[128,128], index: 3, kind: input, shape index: {}]   ;;  %s1294_s4 = inlined_call_operand.vmem [shape: f32[1,128], index: 4, kind: input, shape index: {}]   ;;  %s1295_s5 = inlined_call_operand.hbm [shape: bf16[128,128], index: 5, kind: input, shape index: {}]   ;;  %s1296_s6 = inlined_call_operand.vmem [shape: f32[1,128], index: 6, kind: input, shape index: {}]   ;;  %s1297_s7 = inlined_call_operand.hbm [shape: bf16[128,128], index: 7, kind: input, shape index: {}]   ;;  %s1298_s8 = inlined_call_operand.vmem [shape: f32[1,128], index: 8, kind: input, shape index: {}]   ;;  %s1299_s9 = inlined_call_operand.hbm [shape: bf16[128,128], index: 9, kind: input, shape index: {}]   ;;  %s1300_s10 = inlined_call_operand.vmem [shape: f32[1,128], index: 10, kind: input, shape index: {}]   ;;  %s1301_s11 = inlined_call_operand.hbm [shape: f32[16,128], index: 11, kind: output, shape index: {}]  }
   0x1   :  { %17 = vsyncpa [#allocation6], 0 }
   0x2   :  { %18 = vsyncpa [#allocation9], 0 }
   0x3   :  { %19 = vsyncpa [#allocation12], 0 }
   0x4   :  { %20 = vsyncpa [#allocation4], 0  ;;  %s1053_s17 = smov [#allocation5]   ;;  %s889_s21 = scalar_lea.hbm %s1291_s1, 256 }
   0x5   :  { %s38_s18 = sshll.u32 %s1053_s17, 4  ;;  %p890_p0 = scmp.ne.s32.totalorder %s1291_s1, %s889_s21  ;;  %s39_s18 = int_to_ptr.vmem [resolvable:$true] %s38_s18 }
   0x6   :  { %p893_p1 = scmp.lt.u32.totalorder %s889_s21, %s1291_s1 }
   0x8   :  { %p895_p2 = pnand %p893_p1, %p890_p0 }
   0xa   :  { %898 = shalt.err (!%p895_p2)
}
   0xb   :  { %s899_s26 = scalar_lea.vmem %s39_s18, 256  ;;  %p904_p4 = scmp.lt.s32.totalorder %s39_s18, %s39_s18 }
   0xc   :  { %p900_p3 = scmp.ne.s32.totalorder %s39_s18, %s899_s26  ;;  %p905_p5 = scmp.lt.s32.totalorder %s899_s26, %s899_s26 }
   0xe   :  { %p906_p6 = por %p905_p5, %p904_p4 }
  0x10   :  { %p907_p7 = pnand %p906_p6, %p900_p3 }
  0x12   :  { %910 = shalt.err (!%p907_p7)
}
  0x13   :  { %s1054_s27 = smov 64   ;;  %s1055_s28 = smov 4  }
  0x14   :  { %44 = dma.hbm_to_vmem [thread:$0]  %s1291_s1, 256, %s39_s18, [#allocation6], %s1054_s27, %s1054_s27, %s1055_s28  }
  0x15   :  { %s1056_s12 = smov [#allocation8]   ;;  %s1057_s14 = smov [#allocation2]  }
  0x16   :  { %s66_s13 = sshll.u32 %s1056_s12, 4  ;;  %s26_s15 = sshll.u32 %s1057_s14, 4  ;;  %s67_s13 = int_to_ptr.vmem [resolvable:$true] %s66_s13  ;;  %s27_s15 = int_to_ptr.vmem [resolvable:$true] %s26_s15 }
  0x17   :  { %s911_s19 = scalar_lea.hbm %s1295_s5, 1024 }
  0x18   :  { %p912_p8 = scmp.ne.s32.totalorder %s1295_s5, %s911_s19  ;;  %p915_p9 = scmp.lt.u32.totalorder %s911_s19, %s1295_s5 }
  0x1a   :  { %p917_p10 = pnand %p915_p9, %p912_p8 }
  0x1c   :  { %920 = shalt.err (!%p917_p10)
}
  0x1d   :  { %s921_s1 = scalar_lea.vmem %s67_s13, 1024  ;;  %p926_p12 = scmp.lt.s32.totalorder %s67_s13, %s67_s13 }
  0x1e   :  { %p922_p11 = scmp.ne.s32.totalorder %s67_s13, %s921_s1  ;;  %p927_p13 = scmp.lt.s32.totalorder %s921_s1, %s921_s1 }
  0x20   :  { %p928_p0 = por %p927_p13, %p926_p12 }
  0x22   :  { %p929_p1 = pnand %p928_p0, %p922_p11 }
  0x24   :  { %932 = shalt.err (!%p929_p1)
}
  0x25   :  { %72 = dma.hbm_to_vmem [thread:$0]  %s1295_s5, 1024, %s67_s13, [#allocation9], %s1054_s27, %s1054_s27, %s1055_s28  }
  0x26   :  { %s933_s29 = scalar_lea.hbm %s1290_s0, 256 }
  0x27   :  { %p934_p2 = scmp.ne.s32.totalorder %s1290_s0, %s933_s29  ;;  %p937_p3 = scmp.lt.u32.totalorder %s933_s29, %s1290_s0 }
  0x29   :  { %p939_p4 = pnand %p937_p3, %p934_p2 }
  0x2b   :  { %942 = shalt.err (!%p939_p4)
}
  0x2c   :  { %s943_s17 = scalar_lea.vmem %s27_s15, 256  ;;  %p948_p6 = scmp.lt.s32.totalorder %s27_s15, %s27_s15 }
  0x2d   :  { %p944_p5 = scmp.ne.s32.totalorder %s27_s15, %s943_s17  ;;  %p949_p7 = scmp.lt.s32.totalorder %s943_s17, %s943_s17 }
  0x2f   :  { %p950_p8 = por %p949_p7, %p948_p6 }
  0x31   :  { %p951_p9 = pnand %p950_p8, %p944_p5 }
  0x33   :  { %954 = shalt.err (!%p951_p9)
}
  0x34   :  { %s1058_s5 = smov 128   ;;  %s1059_s13 = smov 8  }
  0x35   :  { %32 = dma.hbm_to_vmem [thread:$0]  %s1290_s0, 256, %s27_s15, [#allocation3], %s1058_s5, %s1058_s5, %s1059_s13  }
  0x36   :  { %s1060_s21 = smov [#allocation7]   ;;  %s1061_s23 = smov [#allocation10]  }
  0x37   :  { %s52_s22 = sshll.u32 %s1060_s21, 4  ;;  %s80_s1 = sshll.u32 %s1061_s23, 4  ;;  %s53_s22 = int_to_ptr.vmem [resolvable:$true] %s52_s22  ;;  %s81_s1 = int_to_ptr.vmem [resolvable:$true] %s80_s1 }
  0x38   :  { %s955_s25 = scalar_lea.hbm %s1293_s3, 1024 }
  0x39   :  { %p956_p10 = scmp.ne.s32.totalorder %s1293_s3, %s955_s25  ;;  %p959_p11 = scmp.lt.u32.totalorder %s955_s25, %s1293_s3 }
  0x3b   :  { %p961_p12 = pnand %p959_p11, %p956_p10 }
  0x3d   :  { %964 = shalt.err (!%p961_p12)
}
  0x3e   :  { %s965_s0 = scalar_lea.vmem %s53_s22, 1024  ;;  %p970_p0 = scmp.lt.s32.totalorder %s53_s22, %s53_s22 }
  0x3f   :  { %p966_p13 = scmp.ne.s32.totalorder %s53_s22, %s965_s0  ;;  %p971_p1 = scmp.lt.s32.totalorder %s965_s0, %s965_s0 }
  0x41   :  { %p972_p2 = por %p971_p1, %p970_p0 }
  0x43   :  { %p973_p3 = pnand %p972_p2, %p966_p13 }
  0x45   :  { %976 = shalt.err (!%p973_p3)
}
  0x46   :  { %58 = dma.hbm_to_vmem [thread:$0]  %s1293_s3, 1024, %s53_s22, [#allocation6], %s1054_s27, %s1054_s27, %s1055_s28  }
  0x47   :  { %s977_s19 = scalar_lea.hbm %s1297_s7, 1024 }
  0x48   :  { %p978_p4 = scmp.ne.s32.totalorder %s1297_s7, %s977_s19  ;;  %p981_p5 = scmp.lt.u32.totalorder %s977_s19, %s1297_s7 }
  0x4a   :  { %p983_p6 = pnand %p981_p5, %p978_p4 }
  0x4c   :  { %986 = shalt.err (!%p983_p6)
}
  0x4d   :  { %s987_s24 = scalar_lea.vmem %s81_s1, 1024  ;;  %p992_p8 = scmp.lt.s32.totalorder %s81_s1, %s81_s1 }
  0x4e   :  { %p988_p7 = scmp.ne.s32.totalorder %s81_s1, %s987_s24  ;;  %p993_p9 = scmp.lt.s32.totalorder %s987_s24, %s987_s24 }
  0x50   :  { %p994_p10 = por %p993_p9, %p992_p8 }
  0x52   :  { %p995_p11 = pnand %p994_p10, %p988_p7 }
  0x54   :  { %998 = shalt.err (!%p995_p11)
}
  0x55   :  { %86 = dma.hbm_to_vmem [thread:$0]  %s1297_s7, 1024, %s81_s1, [#allocation9], %s1054_s27, %s1054_s27, %s1055_s28  }
  0x56   :  { %s1062_s25 = smov [#allocation11]   ;;  %s999_s12 = scalar_lea.hbm %s1299_s9, 1024 }
  0x57   :  { %s94_s26 = sshll.u32 %s1062_s25, 4  ;;  %p1000_p12 = scmp.ne.s32.totalorder %s1299_s9, %s999_s12  ;;  %s95_s26 = int_to_ptr.vmem [resolvable:$true] %s94_s26 }
  0x58   :  { %p1003_p13 = scmp.lt.u32.totalorder %s999_s12, %s1299_s9 }
  0x5a   :  { %p1005_p0 = pnand %p1003_p13, %p1000_p12 }
  0x5c   :  { %1008 = shalt.err (!%p1005_p0)
}
  0x5d   :  { %s1009_s17 = scalar_lea.vmem %s95_s26, 1024  ;;  %p1014_p2 = scmp.lt.s32.totalorder %s95_s26, %s95_s26 }
  0x5e   :  { %p1010_p1 = scmp.ne.s32.totalorder %s95_s26, %s1009_s17  ;;  %p1015_p3 = scmp.lt.s32.totalorder %s1009_s17, %s1009_s17 }
  0x60   :  { %p1016_p4 = por %p1015_p3, %p1014_p2 }
  0x62   :  { %p1017_p5 = pnand %p1016_p4, %p1010_p1 }
  0x64   :  { %1020 = shalt.err (!%p1017_p5)
}
  0x65   :  { %100 = dma.hbm_to_vmem [thread:$0]  %s1299_s9, 1024, %s95_s26, [#allocation12], %s1054_s27, %s1054_s27, %s1055_s28  }
  0x66   :  { %1043 = dma.done.wait [#allocation3], 256  }
  0x67   :  { %1044 = vsyncadd [#allocation3], 4294967040 }
  0x68   :  { %1045 = dma.done.wait [#allocation6], 1280  }
  0x69   :  { %1046 = vsyncadd [#allocation6], 4294966016 }
  0x6a   :  { %1047 = dma.done.wait [#allocation9], 2048  }
  0x6b   :  { %1048 = vsyncadd [#allocation9], 4294965248 }
  0x6c   :  { %1049 = dma.done.wait [#allocation12], 1024  }
  0x6d   :  { %1050 = vsyncadd [#allocation12], 4294966272  ;;  %v1063_v0 = vmov 0.0   ;;  %vm1064_vm0 = vmmov 0   ;;  %v855_v1 = vld [vmem:[#allocation5] sm:$0xff]   ;;  %v856_v2 = vld [vmem:[#allocation5 + $0x8] sm:$0xff]  }
  0x6e   :  { %754 = vmatprep.subr.bf16.mxu0 %v1063_v0  ;;  %758 = vmatprep.mubr.msk.bf16.mxu0 %vm1064_vm0, %v1063_v0  ;;  %v122_v3 = vld [vmem:[#allocation2] sm:$0xff]  ;;  %v123_v4 = vld [vmem:[#allocation2 + $0x8] sm:$0xff]  ;;  %vm148_vm1 = vcmask 261120   ;;  %v859_v8 = vld [vmem:[#allocation7 + $0x10] sm:$0xff]   ;;  %s1065_s18 = smov [#allocation13]  }
  0x6f   :  { %762 = vmatprep.subr.bf16.mxu1 %v1063_v0  ;;  %778 = vmatprep.mubr.msk.bf16.mxu1 %vm1064_vm0, %v1063_v0  ;;  %v857_v5 = vld [vmem:[#allocation7] sm:$0xff]   ;;  %v124_v6 = vpack.c.bf16 %v123_v4, %v122_v3  ;;  %v858_v7 = vld [vmem:[#allocation7 + $0x8] sm:$0xff]   ;;  %v860_v9 = vld [vmem:[#allocation7 + $0x18] sm:$0xff]   ;;  %s660_s24 = sshll.u32 %s1065_s18, 4  ;;  %s661_s24 = int_to_ptr.vmem [resolvable:$true] %s660_s24 }
  0x70   :  { %755 = vmatpush3.bf16.msra.mxu0 %v855_v1  ;;  %763 = vmatpush3.bf16.msra.mxu1 %v857_v5  ;;  %v861_v10 = vld [vmem:[#allocation7 + $0x20] sm:$0xff]   ;;  %v862_v11 = vld [vmem:[#allocation7 + $0x28] sm:$0xff]   ;;  %v863_v12 = vld [vmem:[#allocation7 + $0x30] sm:$0xff]   ;;  %p1026_p7 = scmp.lt.s32.totalorder %s661_s24, %s661_s24 }
  0x71   :  { %756 = vmatprep.subr.bf16.mxu0 %v1063_v0  ;;  %764 = vmatprep.subr.bf16.mxu1 %v1063_v0  ;;  %v864_v13 = vld [vmem:[#allocation7 + $0x38] sm:$0xff]   ;;  %v865_v14 = vld [vmem:[#allocation8] sm:$0xff]   ;;  %v866_v15 = vld [vmem:[#allocation8 + $0x8] sm:$0xff]  }
  0x72   :  { %v867_v16 = vld [vmem:[#allocation8 + $0x10] sm:$0xff]   ;;  %v868_v17 = vld [vmem:[#allocation8 + $0x18] sm:$0xff]   ;;  %v869_v18 = vld [vmem:[#allocation8 + $0x20] sm:$0xff]  }
  0x73   :  { %v870_v19 = vld [vmem:[#allocation8 + $0x28] sm:$0xff]   ;;  %v675_v20 = vld [vmem:[%s1292_s2] ss:$0 sm:$0xff]  ;;  %v871_v30 = vld [vmem:[#allocation8 + $0x30] sm:$0xff]  }
  0x74   :  { %757 = vmatpush3.bf16.msra.mxu0 %v856_v2  ;;  %765 = vmatpush3.bf16.msra.mxu1 %v858_v7  ;;  %v872_v31 = vld [vmem:[#allocation8 + $0x38] sm:$0xff]   ;;  %v873_v32 = vld [vmem:[#allocation10] sm:$0xff]   ;;  %v874_v33 = vld [vmem:[#allocation10 + $0x8] sm:$0xff]  }
  0x75   :  { %782 = vmatprep.subr.bf16.mxu0 %v1063_v0  ;;  %766 = vmatprep.subr.bf16.mxu1 %v1063_v0  ;;  %v875_v34 = vld [vmem:[#allocation10 + $0x10] sm:$0xff]   ;;  %v876_v35 = vld [vmem:[#allocation10 + $0x18] sm:$0xff]   ;;  %v877_v36 = vld [vmem:[#allocation10 + $0x20] sm:$0xff]  }
  0x76   :  { %v878_v37 = vld [vmem:[#allocation10 + $0x28] sm:$0xff]   ;;  %v679_v38 = vld [vmem:[%s1294_s4] ss:$0 sm:$0xff]  ;;  %v879_v48 = vld [vmem:[#allocation10 + $0x30] sm:$0xff]  }
  0x77   :  { %759 = vmatmul.mubr.msk.bf16.vlgmr.msra.gmra.mrb[0].mxu0 %vm148_vm1, %v124_v6  ;;  %v880_v49 = vld [vmem:[#allocation10 + $0x38] sm:$0xff]   ;;  %v881_v50 = vld [vmem:[#allocation11] sm:$0xff]   ;;  %v882_v51 = vld [vmem:[#allocation11 + $0x8] sm:$0xff]  }
  0x78   :  { %798 = vmatprep.mubr.msk.bf16.mxu0 %vm1064_vm0, %v1063_v0  ;;  %767 = vmatpush3.bf16.msra.mxu1 %v859_v8  ;;  %v883_v52 = vld [vmem:[#allocation11 + $0x10] sm:$0xff]   ;;  %v884_v53 = vld [vmem:[#allocation11 + $0x18] sm:$0xff]   ;;  %v885_v54 = vld [vmem:[#allocation11 + $0x20] sm:$0xff]  }
  0x79   :  { %768 = vmatprep.subr.bf16.mxu1 %v1063_v0  ;;  %783 = vmatpush3.bf16.msra.mxu0 %v865_v14  ;;  %v886_v55 = vld [vmem:[#allocation11 + $0x28] sm:$0xff]   ;;  %v688_v56 = vld [vmem:[%s1296_s6] ss:$0 sm:$0xff]  ;;  %v887_v3 = vld [vmem:[#allocation11 + $0x30] sm:$0xff]  }
  0x7a   :  { %784 = vmatprep.subr.bf16.mxu0 %v1063_v0  ;;  %v888_v4 = vld [vmem:[#allocation11 + $0x38] sm:$0xff]   ;;  %v697_v5 = vld [vmem:[%s1298_s8] ss:$0 sm:$0xff]  ;;  %s1021_s8 = scalar_lea.vmem %s661_s24, 256 }
  0x7b   :  { %p1022_p6 = scmp.ne.s32.totalorder %s661_s24, %s1021_s8  ;;  %p1027_p8 = scmp.lt.s32.totalorder %s1021_s8, %s1021_s8 }
  0x7c   :  { %769 = vmatpush3.bf16.msra.mxu1 %v860_v9 }
  0x7d   :  { %770 = vmatprep.subr.bf16.mxu1 %v1063_v0  ;;  %785 = vmatpush3.bf16.msra.mxu0 %v866_v15  ;;  %p1028_p9 = por %p1027_p8, %p1026_p7 }
  0x7e   :  { %786 = vmatprep.subr.bf16.mxu0 %v1063_v0 }
  0x7f   :  { %p1029_p10 = pnand %p1028_p9, %p1022_p6 }
  0x80   :  { %771 = vmatpush3.bf16.msra.mxu1 %v861_v10 }
  0x81   :  { %772 = vmatprep.subr.bf16.mxu1 %v1063_v0  ;;  %787 = vmatpush3.bf16.msra.mxu0 %v867_v16 }
  0x82   :  { %788 = vmatprep.subr.bf16.mxu0 %v1063_v0 }
  0x84   :  { %773 = vmatpush3.bf16.msra.mxu1 %v862_v11 }
  0x85   :  { %774 = vmatprep.subr.bf16.mxu1 %v1063_v0  ;;  %789 = vmatpush3.bf16.msra.mxu0 %v868_v17 }
  0x86   :  { %790 = vmatprep.subr.bf16.mxu0 %v1063_v0 }
  0x88   :  { %775 = vmatpush3.bf16.msra.mxu1 %v863_v12 }
  0x89   :  { %776 = vmatprep.subr.bf16.mxu1 %v1063_v0  ;;  %791 = vmatpush3.bf16.msra.mxu0 %v869_v18 }
  0x8a   :  { %792 = vmatprep.subr.bf16.mxu0 %v1063_v0 }
  0x8c   :  { %777 = vmatpush3.bf16.msra.mxu1 %v864_v13 }
  0x8d   :  { %802 = vmatprep.subr.bf16.mxu1 %v1063_v0  ;;  %793 = vmatpush3.bf16.msra.mxu0 %v870_v19 }
  0x8e   :  { %794 = vmatprep.subr.bf16.mxu0 %v1063_v0 }
  0x91   :  { %795 = vmatpush3.bf16.msra.mxu0 %v871_v30 }
  0x92   :  { %796 = vmatprep.subr.bf16.mxu0 %v1063_v0 }
  0x95   :  { %797 = vmatpush3.bf16.msra.mxu0 %v872_v31 }
  0x96   :  { %822 = vmatprep.subr.bf16.mxu0 %v1063_v0 }
 0x14a   :  { %v186_v21 = vpop.f32.mrb[0].mxu0 }
 0x14b   :  { %v187_v22 = vadd.f32 %v675_v20, %v186_v21  ;;  %v760_v23 = vpop.f32.mrb[1].mxu0 }
 0x14c   :  { %v189_v24 = vpop.f32.mrb[2].mxu0 }
 0x14d   :  { %v190_v25 = vadd.f32 %v675_v20, %v189_v24  ;;  %v761_v26 = vpop.f32.mrb[3].mxu0  ;;  %v193_v27 = vmax.f32 %v187_v22, 0.0 }
 0x14f   :  { %v194_v28 = vmax.f32 %v190_v25, 0.0 }
 0x151   :  { %v195_v29 = vpack.c.bf16 %v194_v28, %v193_v27 }
 0x153   :  { %779 = vmatmul.mubr.bf16.vlgmr.msra.gmra.mrb[0].mxu1 %v195_v29 }
 0x154   :  { %818 = vmatprep.mubr.msk.bf16.mxu1 %vm1064_vm0, %v1063_v0  ;;  %803 = vmatpush3.bf16.msra.mxu1 %v873_v32 }
 0x155   :  { %804 = vmatprep.subr.bf16.mxu1 %v1063_v0 }
 0x158   :  { %805 = vmatpush3.bf16.msra.mxu1 %v874_v33 }
 0x159   :  { %806 = vmatprep.subr.bf16.mxu1 %v1063_v0 }
 0x15c   :  { %807 = vmatpush3.bf16.msra.mxu1 %v875_v34 }
 0x15d   :  { %808 = vmatprep.subr.bf16.mxu1 %v1063_v0 }
 0x160   :  { %809 = vmatpush3.bf16.msra.mxu1 %v876_v35 }
 0x161   :  { %810 = vmatprep.subr.bf16.mxu1 %v1063_v0 }
 0x164   :  { %811 = vmatpush3.bf16.msra.mxu1 %v877_v36 }
 0x165   :  { %812 = vmatprep.subr.bf16.mxu1 %v1063_v0 }
 0x168   :  { %813 = vmatpush3.bf16.msra.mxu1 %v878_v37 }
 0x169   :  { %814 = vmatprep.subr.bf16.mxu1 %v1063_v0 }
 0x16c   :  { %815 = vmatpush3.bf16.msra.mxu1 %v879_v48 }
 0x16d   :  { %816 = vmatprep.subr.bf16.mxu1 %v1063_v0 }
 0x170   :  { %817 = vmatpush3.bf16.msra.mxu1 %v880_v49 }
 0x226   :  { %v301_v39 = vpop.f32.mrb[0].mxu1 }
 0x227   :  { %v302_v40 = vadd.f32 %v679_v38, %v301_v39  ;;  %v780_v41 = vpop.f32.mrb[1].mxu1 }
 0x228   :  { %v304_v42 = vpop.f32.mrb[2].mxu1 }
 0x229   :  { %v305_v43 = vadd.f32 %v679_v38, %v304_v42  ;;  %v781_v44 = vpop.f32.mrb[3].mxu1  ;;  %v308_v45 = vmax.f32 %v302_v40, 0.0 }
 0x22b   :  { %v309_v46 = vmax.f32 %v305_v43, 0.0 }
 0x22d   :  { %v310_v47 = vpack.c.bf16 %v309_v46, %v308_v45 }
 0x22f   :  { %799 = vmatmul.mubr.bf16.vlgmr.msra.gmra.mrb[4].mxu0 %v310_v47 }
 0x230   :  { %838 = vmatprep.mubr.msk.bf16.mxu0 %vm1064_vm0, %v1063_v0  ;;  %823 = vmatpush3.bf16.msra.mxu0 %v881_v50 }
 0x231   :  { %824 = vmatprep.subr.bf16.mxu0 %v1063_v0 }
 0x234   :  { %825 = vmatpush3.bf16.msra.mxu0 %v882_v51 }
 0x235   :  { %826 = vmatprep.subr.bf16.mxu0 %v1063_v0 }
 0x238   :  { %827 = vmatpush3.bf16.msra.mxu0 %v883_v52 }
 0x239   :  { %828 = vmatprep.subr.bf16.mxu0 %v1063_v0 }
 0x23c   :  { %829 = vmatpush3.bf16.msra.mxu0 %v884_v53 }
 0x23d   :  { %830 = vmatprep.subr.bf16.mxu0 %v1063_v0 }
 0x240   :  { %831 = vmatpush3.bf16.msra.mxu0 %v885_v54 }
 0x241   :  { %832 = vmatprep.subr.bf16.mxu0 %v1063_v0 }
 0x244   :  { %833 = vmatpush3.bf16.msra.mxu0 %v886_v55 }
 0x245   :  { %834 = vmatprep.subr.bf16.mxu0 %v1063_v0 }
 0x248   :  { %835 = vmatpush3.bf16.msra.mxu0 %v887_v3 }
 0x249   :  { %836 = vmatprep.subr.bf16.mxu0 %v1063_v0  ;;  %v706_v0 = vld [vmem:[%s1300_s10] ss:$0 sm:$0xff] }
 0x24c   :  { %837 = vmatpush3.bf16.msra.mxu0 %v888_v4 }
 0x302   :  { %v416_v57 = vpop.f32.mrb[4].mxu0 }
 0x303   :  { %v417_v58 = vadd.f32 %v688_v56, %v416_v57  ;;  %v800_v59 = vpop.f32.mrb[5].mxu0 }
 0x304   :  { %v419_v60 = vpop.f32.mrb[6].mxu0 }
 0x305   :  { %v420_v61 = vadd.f32 %v688_v56, %v419_v60  ;;  %v801_v62 = vpop.f32.mrb[7].mxu0  ;;  %v423_v63 = vmax.f32 %v417_v58, 0.0 }
 0x307   :  { %v424_v1 = vmax.f32 %v420_v61, 0.0 }
 0x309   :  { %v425_v2 = vpack.c.bf16 %v424_v1, %v423_v63 }
 0x30b   :  { %819 = vmatmul.mubr.bf16.vlgmr.msra.gmra.mrb[4].mxu1 %v425_v2 }
 0x3de   :  { %v531_v6 = vpop.f32.mrb[4].mxu1 }
 0x3df   :  { %v532_v7 = vadd.f32 %v697_v5, %v531_v6  ;;  %v820_v8 = vpop.f32.mrb[5].mxu1 }
 0x3e0   :  { %v534_v9 = vpop.f32.mrb[6].mxu1 }
 0x3e1   :  { %v535_v10 = vadd.f32 %v697_v5, %v534_v9  ;;  %v821_v11 = vpop.f32.mrb[7].mxu1  ;;  %v538_v12 = vmax.f32 %v532_v7, 0.0 }
 0x3e3   :  { %v539_v13 = vmax.f32 %v535_v10, 0.0 }
 0x3e5   :  { %v540_v14 = vpack.c.bf16 %v539_v13, %v538_v12 }
 0x3e7   :  { %839 = vmatmul.mubr.bf16.vlgmr.msra.gmra.mrb[8].mxu0 %v540_v14 }
 0x4ba   :  { %v646_v15 = vpop.f32.mrb[8].mxu0 }
 0x4bb   :  { %v647_v16 = vadd.f32 %v706_v0, %v646_v15  ;;  %v840_v17 = vpop.f32.mrb[9].mxu0 }
 0x4bc   :  { %v649_v18 = vpop.f32.mrb[10].mxu0 }
 0x4bd   :  { %653 = vst [vmem:[#allocation13] sm:$0xff] %v647_v16  ;;  %v650_v19 = vadd.f32 %v706_v0, %v649_v18  ;;  %v841_v20 = vpop.f32.mrb[11].mxu0 }
 0x4bf   :  { %654 = vst [vmem:[#allocation13 + $0x8] sm:$0xff] %v650_v19 }
 0x4c0   :  { %1032 = shalt.err (!%p1029_p10)
}
 0x4c1   :  { %s1033_s22 = scalar_lea.hbm %s1301_s11, 256 }
 0x4c2   :  { %p1034_p11 = scmp.ne.s32.totalorder %s1301_s11, %s1033_s22  ;;  %p1037_p12 = scmp.lt.u32.totalorder %s1033_s22, %s1301_s11 }
 0x4c4   :  { %p1039_p13 = pnand %p1037_p12, %p1034_p11 }
 0x4c6   :  { %1042 = shalt.err (!%p1039_p13)
}
 0x4c7   :  { %666 = dma.vmem_to_hbm [thread:$0]  %s661_s24, 256, %s1301_s11, [#allocation4], %s1058_s5, %s1058_s5, %s1059_s13  }
 0x4c8   :  { %1051 = dma.done.wait [#allocation4], 256  }
 0x4c9   :  { %1052 = vsyncadd [#allocation4], 4294967040 }
 0x4ca   :  { %670 = vsyncpa [#allocation3], 1 }
 0x4cb   :  { %671 = vsyncpa [#allocation6], 1 }
 0x4cc   :  { %672 = vsyncpa [#allocation9], 1 }
 0x4cd   :  { %673 = vsyncpa [#allocation12], 1 }
 0x4ce   :  { %674 = vsyncpa [#allocation4], 1 }

// kernel: tpu_custom_call.1
= control target key start
LH: loop header
LB: loop body
LE: loop exit
PB: predicated region body
PF: predicated region fallthrough
CT: control target
= control target key end

     0   :  { %16 = vsyncpa [#allocation3], 0  ;;  %s1290_s0 = inlined_call_operand.hbm [shape: f32[16,32], index: 0, kind: input, shape index: {}]   ;;  %s1291_s1 = inlined_call_operand.hbm [shape: bf16[32,128], index: 1, kind: input, shape index: {}]   ;;  %s1292_s2 = inlined_call_operand.vmem [shape: f32[1,128], index: 2, kind: input, shape index: {}]   ;;  %s1293_s3 = inlined_call_operand.hbm [shape: bf16[128,128], index: 3, kind: input, shape index: {}]   ;;  %s1294_s4 = inlined_call_operand.vmem [shape: f32[1,128], index: 4, kind: input, shape index: {}]   ;;  %s1295_s5 = inlined_call_operand.hbm [shape: bf16[128,128], index: 5, kind: input, shape index: {}]   ;;  %s1296_s6 = inlined_call_operand.vmem [shape: f32[1,128], index: 6, kind: input, shape index: {}]   ;;  %s1297_s7 = inlined_call_operand.hbm [shape: bf16[128,128], index: 7, kind: input, shape index: {}]   ;;  %s1298_s8 = inlined_call_operand.vmem [shape: f32[1,128], index: 8, kind: input, shape index: {}]   ;;  %s1299_s9 = inlined_call_operand.hbm [shape: bf16[128,128], index: 9, kind: input, shape index: {}]   ;;  %s1300_s10 = inlined_call_operand.vmem [shape: f32[1,128], index: 10, kind: input, shape index: {}]   ;;  %s1301_s11 = inlined_call_operand.hbm [shape: f32[16,128], index: 11, kind: output, shape index: {}]  }
   0x1   :  { %17 = vsyncpa [#allocation6], 0 }
   0x2   :  { %18 = vsyncpa [#allocation9], 0 }
   0x3   :  { %19 = vsyncpa [#allocation12], 0 }
   0x4   :  { %20 = vsyncpa [#allocation4], 0  ;;  %s1053_s17 = smov [#allocation5]   ;;  %s889_s21 = scalar_lea.hbm %s1291_s1, 256 }
   0x5   :  { %s38_s18 = sshll.u32 %s1053_s17, 4  ;;  %p890_p0 = scmp.ne.s32.totalorder %s1291_s1, %s889_s21  ;;  %s39_s18 = int_to_ptr.vmem [resolvable:$true] %s38_s18 }
   0x6   :  { %p893_p1 = scmp.lt.u32.totalorder %s889_s21, %s1291_s1 }
   0x8   :  { %p895_p2 = pnand %p893_p1, %p890_p0 }
   0xa   :  { %898 = shalt.err (!%p895_p2)
}
   0xb   :  { %s899_s26 = scalar_lea.vmem %s39_s18, 256  ;;  %p904_p4 = scmp.lt.s32.totalorder %s39_s18, %s39_s18 }
   0xc   :  { %p900_p3 = scmp.ne.s32.totalorder %s39_s18, %s899_s26  ;;  %p905_p5 = scmp.lt.s32.totalorder %s899_s26, %s899_s26 }
   0xe   :  { %p906_p6 = por %p905_p5, %p904_p4 }
  0x10   :  { %p907_p7 = pnand %p906_p6, %p900_p3 }
  0x12   :  { %910 = shalt.err (!%p907_p7)
}
  0x13   :  { %s1054_s27 = smov 64   ;;  %s1055_s28 = smov 4  }
  0x14   :  { %44 = dma.hbm_to_vmem [thread:$0]  %s1291_s1, 256, %s39_s18, [#allocation6], %s1054_s27, %s1054_s27, %s1055_s28  }
  0x15   :  { %s1056_s12 = smov [#allocation8]   ;;  %s1057_s14 = smov [#allocation2]  }
  0x16   :  { %s66_s13 = sshll.u32 %s1056_s12, 4  ;;  %s26_s15 = sshll.u32 %s1057_s14, 4  ;;  %s67_s13 = int_to_ptr.vmem [resolvable:$true] %s66_s13  ;;  %s27_s15 = int_to_ptr.vmem [resolvable:$true] %s26_s15 }
  0x17   :  { %s911_s19 = scalar_lea.hbm %s1295_s5, 1024 }
  0x18   :  { %p912_p8 = scmp.ne.s32.totalorder %s1295_s5, %s911_s19  ;;  %p915_p9 = scmp.lt.u32.totalorder %s911_s19, %s1295_s5 }
  0x1a   :  { %p917_p10 = pnand %p915_p9, %p912_p8 }
  0x1c   :  { %920 = shalt.err (!%p917_p10)
}
  0x1d   :  { %s921_s1 = scalar_lea.vmem %s67_s13, 1024  ;;  %p926_p12 = scmp.lt.s32.totalorder %s67_s13, %s67_s13 }
  0x1e   :  { %p922_p11 = scmp.ne.s32.totalorder %s67_s13, %s921_s1  ;;  %p927_p13 = scmp.lt.s32.totalorder %s921_s1, %s921_s1 }
  0x20   :  { %p928_p0 = por %p927_p13, %p926_p12 }
  0x22   :  { %p929_p1 = pnand %p928_p0, %p922_p11 }
  0x24   :  { %932 = shalt.err (!%p929_p1)
}
  0x25   :  { %72 = dma.hbm_to_vmem [thread:$0]  %s1295_s5, 1024, %s67_s13, [#allocation9], %s1054_s27, %s1054_s27, %s1055_s28  }
  0x26   :  { %s933_s29 = scalar_lea.hbm %s1290_s0, 256 }
  0x27   :  { %p934_p2 = scmp.ne.s32.totalorder %s1290_s0, %s933_s29  ;;  %p937_p3 = scmp.lt.u32.totalorder %s933_s29, %s1290_s0 }
  0x29   :  { %p939_p4 = pnand %p937_p3, %p934_p2 }
  0x2b   :  { %942 = shalt.err (!%p939_p4)
}
  0x2c   :  { %s943_s17 = scalar_lea.vmem %s27_s15, 256  ;;  %p948_p6 = scmp.lt.s32.totalorder %s27_s15, %s27_s15 }
  0x2d   :  { %p944_p5 = scmp.ne.s32.totalorder %s27_s15, %s943_s17  ;;  %p949_p7 = scmp.lt.s32.totalorder %s943_s17, %s943_s17 }
  0x2f   :  { %p950_p8 = por %p949_p7, %p948_p6 }
  0x31   :  { %p951_p9 = pnand %p950_p8, %p944_p5 }
  0x33   :  { %954 = shalt.err (!%p951_p9)
}
  0x34   :  { %s1058_s5 = smov 128   ;;  %s1059_s13 = smov 8  }
  0x35   :  { %32 = dma.hbm_to_vmem [thread:$0]  %s1290_s0, 256, %s27_s15, [#allocation3], %s1058_s5, %s1058_s5, %s1059_s13  }
  0x36   :  { %s1060_s21 = smov [#allocation7]   ;;  %s1061_s23 = smov [#allocation10]  }
  0x37   :  { %s52_s22 = sshll.u32 %s1060_s21, 4  ;;  %s80_s1 = sshll.u32 %s1061_s23, 4  ;;  %s53_s22 = int_to_ptr.vmem [resolvable:$true] %s52_s22  ;;  %s81_s1 = int_to_ptr.vmem [resolvable:$true] %s80_s1 }
  0x38   :  { %s955_s25 = scalar_lea.hbm %s1293_s3, 1024 }
  0x39   :  { %p956_p10 = scmp.ne.s32.totalorder %s1293_s3, %s955_s25  ;;  %p959_p11 = scmp.lt.u32.totalorder %s955_s25, %s1293_s3 }
  0x3b   :  { %p961_p12 = pnand %p959_p11, %p956_p10 }
  0x3d   :  { %964 = shalt.err (!%p961_p12)
}
  0x3e   :  { %s965_s0 = scalar_lea.vmem %s53_s22, 1024  ;;  %p970_p0 = scmp.lt.s32.totalorder %s53_s22, %s53_s22 }
  0x3f   :  { %p966_p13 = scmp.ne.s32.totalorder %s53_s22, %s965_s0  ;;  %p971_p1 = scmp.lt.s32.totalorder %s965_s0, %s965_s0 }
  0x41   :  { %p972_p2 = por %p971_p1, %p970_p0 }
  0x43   :  { %p973_p3 = pnand %p972_p2, %p966_p13 }
  0x45   :  { %976 = shalt.err (!%p973_p3)
}
  0x46   :  { %58 = dma.hbm_to_vmem [thread:$0]  %s1293_s3, 1024, %s53_s22, [#allocation6], %s1054_s27, %s1054_s27, %s1055_s28  }
  0x47   :  { %s977_s19 = scalar_lea.hbm %s1297_s7, 1024 }
  0x48   :  { %p978_p4 = scmp.ne.s32.totalorder %s1297_s7, %s977_s19  ;;  %p981_p5 = scmp.lt.u32.totalorder %s977_s19, %s1297_s7 }
  0x4a   :  { %p983_p6 = pnand %p981_p5, %p978_p4 }
  0x4c   :  { %986 = shalt.err (!%p983_p6)
}
  0x4d   :  { %s987_s24 = scalar_lea.vmem %s81_s1, 1024  ;;  %p992_p8 = scmp.lt.s32.totalorder %s81_s1, %s81_s1 }
  0x4e   :  { %p988_p7 = scmp.ne.s32.totalorder %s81_s1, %s987_s24  ;;  %p993_p9 = scmp.lt.s32.totalorder %s987_s24, %s987_s24 }
  0x50   :  { %p994_p10 = por %p993_p9, %p992_p8 }
  0x52   :  { %p995_p11 = pnand %p994_p10, %p988_p7 }
  0x54   :  { %998 = shalt.err (!%p995_p11)
}
  0x55   :  { %86 = dma.hbm_to_vmem [thread:$0]  %s1297_s7, 1024, %s81_s1, [#allocation9], %s1054_s27, %s1054_s27, %s1055_s28  }
  0x56   :  { %s1062_s25 = smov [#allocation11]   ;;  %s999_s12 = scalar_lea.hbm %s1299_s9, 1024 }
  0x57   :  { %s94_s26 = sshll.u32 %s1062_s25, 4  ;;  %p1000_p12 = scmp.ne.s32.totalorder %s1299_s9, %s999_s12  ;;  %s95_s26 = int_to_ptr.vmem [resolvable:$true] %s94_s26 }
  0x58   :  { %p1003_p13 = scmp.lt.u32.totalorder %s999_s12, %s1299_s9 }
  0x5a   :  { %p1005_p0 = pnand %p1003_p13, %p1000_p12 }
  0x5c   :  { %1008 = shalt.err (!%p1005_p0)
}
  0x5d   :  { %s1009_s17 = scalar_lea.vmem %s95_s26, 1024  ;;  %p1014_p2 = scmp.lt.s32.totalorder %s95_s26, %s95_s26 }
  0x5e   :  { %p1010_p1 = scmp.ne.s32.totalorder %s95_s26, %s1009_s17  ;;  %p1015_p3 = scmp.lt.s32.totalorder %s1009_s17, %s1009_s17 }
  0x60   :  { %p1016_p4 = por %p1015_p3, %p1014_p2 }
  0x62   :  { %p1017_p5 = pnand %p1016_p4, %p1010_p1 }
  0x64   :  { %1020 = shalt.err (!%p1017_p5)
}
  0x65   :  { %100 = dma.hbm_to_vmem [thread:$0]  %s1299_s9, 1024, %s95_s26, [#allocation12], %s1054_s27, %s1054_s27, %s1055_s28  }
  0x66   :  { %1043 = dma.done.wait [#allocation3], 256  }
  0x67   :  { %1044 = vsyncadd [#allocation3], 4294967040 }
  0x68   :  { %1045 = dma.done.wait [#allocation6], 1280  }
  0x69   :  { %1046 = vsyncadd [#allocation6], 4294966016 }
  0x6a   :  { %1047 = dma.done.wait [#allocation9], 2048  }
  0x6b   :  { %1048 = vsyncadd [#allocation9], 4294965248 }
  0x6c   :  { %1049 = dma.done.wait [#allocation12], 1024  }
  0x6d   :  { %1050 = vsyncadd [#allocation12], 4294966272  ;;  %v1063_v0 = vmov 0.0   ;;  %vm1064_vm0 = vmmov 0   ;;  %v855_v1 = vld [vmem:[#allocation5] sm:$0xff]   ;;  %v856_v2 = vld [vmem:[#allocation5 + $0x8] sm:$0xff]  }
  0x6e   :  { %754 = vmatprep.subr.bf16.mxu0 %v1063_v0  ;;  %758 = vmatprep.mubr.msk.bf16.mxu0 %vm1064_vm0, %v1063_v0  ;;  %v122_v3 = vld [vmem:[#allocation2] sm:$0xff]  ;;  %v123_v4 = vld [vmem:[#allocation2 + $0x8] sm:$0xff]  ;;  %vm148_vm1 = vcmask 261120   ;;  %v859_v8 = vld [vmem:[#allocation7 + $0x10] sm:$0xff]   ;;  %s1065_s18 = smov [#allocation13]  }
  0x6f   :  { %762 = vmatprep.subr.bf16.mxu1 %v1063_v0  ;;  %778 = vmatprep.mubr.msk.bf16.mxu1 %vm1064_vm0, %v1063_v0  ;;  %v857_v5 = vld [vmem:[#allocation7] sm:$0xff]   ;;  %v124_v6 = vpack.c.bf16 %v123_v4, %v122_v3  ;;  %v858_v7 = vld [vmem:[#allocation7 + $0x8] sm:$0xff]   ;;  %v860_v9 = vld [vmem:[#allocation7 + $0x18] sm:$0xff]   ;;  %s660_s24 = sshll.u32 %s1065_s18, 4  ;;  %s661_s24 = int_to_ptr.vmem [resolvable:$true] %s660_s24 }
  0x70   :  { %755 = vmatpush3.bf16.msra.mxu0 %v855_v1  ;;  %763 = vmatpush3.bf16.msra.mxu1 %v857_v5  ;;  %v861_v10 = vld [vmem:[#allocation7 + $0x20] sm:$0xff]   ;;  %v862_v11 = vld [vmem:[#allocation7 + $0x28] sm:$0xff]   ;;  %v863_v12 = vld [vmem:[#allocation7 + $0x30] sm:$0xff]   ;;  %p1026_p7 = scmp.lt.s32.totalorder %s661_s24, %s661_s24 }
  0x71   :  { %756 = vmatprep.subr.bf16.mxu0 %v1063_v0  ;;  %764 = vmatprep.subr.bf16.mxu1 %v1063_v0  ;;  %v864_v13 = vld [vmem:[#allocation7 + $0x38] sm:$0xff]   ;;  %v865_v14 = vld [vmem:[#allocation8] sm:$0xff]   ;;  %v866_v15 = vld [vmem:[#allocation8 + $0x8] sm:$0xff]  }
  0x72   :  { %v867_v16 = vld [vmem:[#allocation8 + $0x10] sm:$0xff]   ;;  %v868_v17 = vld [vmem:[#allocation8 + $0x18] sm:$0xff]   ;;  %v869_v18 = vld [vmem:[#allocation8 + $0x20] sm:$0xff]  }
  0x73   :  { %v870_v19 = vld [vmem:[#allocation8 + $0x28] sm:$0xff]   ;;  %v675_v20 = vld [vmem:[%s1292_s2] ss:$0 sm:$0xff]  ;;  %v871_v30 = vld [vmem:[#allocation8 + $0x30] sm:$0xff]  }
  0x74   :  { %757 = vmatpush3.bf16.msra.mxu0 %v856_v2  ;;  %765 = vmatpush3.bf16.msra.mxu1 %v858_v7  ;;  %v872_v31 = vld [vmem:[#allocation8 + $0x38] sm:$0xff]   ;;  %v873_v32 = vld [vmem:[#allocation10] sm:$0xff]   ;;  %v874_v33 = vld [vmem:[#allocation10 + $0x8] sm:$0xff]  }
  0x75   :  { %782 = vmatprep.subr.bf16.mxu0 %v1063_v0  ;;  %766 = vmatprep.subr.bf16.mxu1 %v1063_v0  ;;  %v875_v34 = vld [vmem:[#allocation10 + $0x10] sm:$0xff]   ;;  %v876_v35 = vld [vmem:[#allocation10 + $0x18] sm:$0xff]   ;;  %v877_v36 = vld [vmem:[#allocation10 + $0x20] sm:$0xff]  }
  0x76   :  { %v878_v37 = vld [vmem:[#allocation10 + $0x28] sm:$0xff]   ;;  %v679_v38 = vld [vmem:[%s1294_s4] ss:$0 sm:$0xff]  ;;  %v879_v48 = vld [vmem:[#allocation10 + $0x30] sm:$0xff]  }
  0x77   :  { %759 = vmatmul.mubr.msk.bf16.vlgmr.msra.gmra.mrb[0].mxu0 %vm148_vm1, %v124_v6  ;;  %v880_v49 = vld [vmem:[#allocation10 + $0x38] sm:$0xff]   ;;  %v881_v50 = vld [vmem:[#allocation11] sm:$0xff]   ;;  %v882_v51 = vld [vmem:[#allocation11 + $0x8] sm:$0xff]  }
  0x78   :  { %798 = vmatprep.mubr.msk.bf16.mxu0 %vm1064_vm0, %v1063_v0  ;;  %767 = vmatpush3.bf16.msra.mxu1 %v859_v8  ;;  %v883_v52 = vld [vmem:[#allocation11 + $0x10] sm:$0xff]   ;;  %v884_v53 = vld [vmem:[#allocation11 + $0x18] sm:$0xff]   ;;  %v885_v54 = vld [vmem:[#allocation11 + $0x20] sm:$0xff]  }
  0x79   :  { %768 = vmatprep.subr.bf16.mxu1 %v1063_v0  ;;  %783 = vmatpush3.bf16.msra.mxu0 %v865_v14  ;;  %v886_v55 = vld [vmem:[#allocation11 + $0x28] sm:$0xff]   ;;  %v688_v56 = vld [vmem:[%s1296_s6] ss:$0 sm:$0xff]  ;;  %v887_v3 = vld [vmem:[#allocation11 + $0x30] sm:$0xff]  }
  0x7a   :  { %784 = vmatprep.subr.bf16.mxu0 %v1063_v0  ;;  %v888_v4 = vld [vmem:[#allocation11 + $0x38] sm:$0xff]   ;;  %v697_v5 = vld [vmem:[%s1298_s8] ss:$0 sm:$0xff]  ;;  %s1021_s8 = scalar_lea.vmem %s661_s24, 256 }
  0x7b   :  { %p1022_p6 = scmp.ne.s32.totalorder %s661_s24, %s1021_s8  ;;  %p1027_p8 = scmp.lt.s32.totalorder %s1021_s8, %s1021_s8 }
  0x7c   :  { %769 = vmatpush3.bf16.msra.mxu1 %v860_v9 }
  0x7d   :  { %770 = vmatprep.subr.bf16.mxu1 %v1063_v0  ;;  %785 = vmatpush3.bf16.msra.mxu0 %v866_v15  ;;  %p1028_p9 = por %p1027_p8, %p1026_p7 }
  0x7e   :  { %786 = vmatprep.subr.bf16.mxu0 %v1063_v0 }
  0x7f   :  { %p1029_p10 = pnand %p1028_p9, %p1022_p6 }
  0x80   :  { %771 = vmatpush3.bf16.msra.mxu1 %v861_v10 }
  0x81   :  { %772 = vmatprep.subr.bf16.mxu1 %v1063_v0  ;;  %787 = vmatpush3.bf16.msra.mxu0 %v867_v16 }
  0x82   :  { %788 = vmatprep.subr.bf16.mxu0 %v1063_v0 }
  0x84   :  { %773 = vmatpush3.bf16.msra.mxu1 %v862_v11 }
  0x85   :  { %774 = vmatprep.subr.bf16.mxu1 %v1063_v0  ;;  %789 = vmatpush3.bf16.msra.mxu0 %v868_v17 }
  0x86   :  { %790 = vmatprep.subr.bf16.mxu0 %v1063_v0 }
  0x88   :  { %775 = vmatpush3.bf16.msra.mxu1 %v863_v12 }
  0x89   :  { %776 = vmatprep.subr.bf16.mxu1 %v1063_v0  ;;  %791 = vmatpush3.bf16.msra.mxu0 %v869_v18 }
  0x8a   :  { %792 = vmatprep.subr.bf16.mxu0 %v1063_v0 }
  0x8c   :  { %777 = vmatpush3.bf16.msra.mxu1 %v864_v13 }
  0x8d   :  { %802 = vmatprep.subr.bf16.mxu1 %v1063_v0  ;;  %793 = vmatpush3.bf16.msra.mxu0 %v870_v19 }
  0x8e   :  { %794 = vmatprep.subr.bf16.mxu0 %v1063_v0 }
  0x91   :  { %795 = vmatpush3.bf16.msra.mxu0 %v871_v30 }
  0x92   :  { %796 = vmatprep.subr.bf16.mxu0 %v1063_v0 }
  0x95   :  { %797 = vmatpush3.bf16.msra.mxu0 %v872_v31 }
  0x96   :  { %822 = vmatprep.subr.bf16.mxu0 %v1063_v0 }
 0x14a   :  { %v186_v21 = vpop.f32.mrb[0].mxu0 }
 0x14b   :  { %v187_v22 = vadd.f32 %v675_v20, %v186_v21  ;;  %v760_v23 = vpop.f32.mrb[1].mxu0 }
 0x14c   :  { %v189_v24 = vpop.f32.mrb[2].mxu0 }
 0x14d   :  { %v190_v25 = vadd.f32 %v675_v20, %v189_v24  ;;  %v761_v26 = vpop.f32.mrb[3].mxu0  ;;  %v193_v27 = vmax.f32 %v187_v22, 0.0 }
 0x14f   :  { %v194_v28 = vmax.f32 %v190_v25, 0.0 }
 0x151   :  { %v195_v29 = vpack.c.bf16 %v194_v28, %v193_v27 }
 0x153   :  { %779 = vmatmul.mubr.bf16.vlgmr.msra.gmra.mrb[0].mxu1 %v195_v29 }
 0x154   :  { %818 = vmatprep.mubr.msk.bf16.mxu1 %vm1064_vm0, %v1063_v0  ;;  %803 = vmatpush3.bf16.msra.mxu1 %v873_v32 }
 0x155   :  { %804 = vmatprep.subr.bf16.mxu1 %v1063_v0 }
 0x158   :  { %805 = vmatpush3.bf16.msra.mxu1 %v874_v33 }
 0x159   :  { %806 = vmatprep.subr.bf16.mxu1 %v1063_v0 }
 0x15c   :  { %807 = vmatpush3.bf16.msra.mxu1 %v875_v34 }
 0x15d   :  { %808 = vmatprep.subr.bf16.mxu1 %v1063_v0 }
 0x160   :  { %809 = vmatpush3.bf16.msra.mxu1 %v876_v35 }
 0x161   :  { %810 = vmatprep.subr.bf16.mxu1 %v1063_v0 }
 0x164   :  { %811 = vmatpush3.bf16.msra.mxu1 %v877_v36 }
 0x165   :  { %812 = vmatprep.subr.bf16.mxu1 %v1063_v0 }
 0x168   :  { %813 = vmatpush3.bf16.msra.mxu1 %v878_v37 }
 0x169   :  { %814 = vmatprep.subr.bf16.mxu1 %v1063_v0 }
 0x16c   :  { %815 = vmatpush3.bf16.msra.mxu1 %v879_v48 }
 0x16d   :  { %816 = vmatprep.subr.bf16.mxu1 %v1063_v0 }
 0x170   :  { %817 = vmatpush3.bf16.msra.mxu1 %v880_v49 }
 0x226   :  { %v301_v39 = vpop.f32.mrb[0].mxu1 }
 0x227   :  { %v302_v40 = vadd.f32 %v679_v38, %v301_v39  ;;  %v780_v41 = vpop.f32.mrb[1].mxu1 }
 0x228   :  { %v304_v42 = vpop.f32.mrb[2].mxu1 }
 0x229   :  { %v305_v43 = vadd.f32 %v679_v38, %v304_v42  ;;  %v781_v44 = vpop.f32.mrb[3].mxu1  ;;  %v308_v45 = vmax.f32 %v302_v40, 0.0 }
 0x22b   :  { %v309_v46 = vmax.f32 %v305_v43, 0.0 }
 0x22d   :  { %v310_v47 = vpack.c.bf16 %v309_v46, %v308_v45 }
 0x22f   :  { %799 = vmatmul.mubr.bf16.vlgmr.msra.gmra.mrb[4].mxu0 %v310_v47 }
 0x230   :  { %838 = vmatprep.mubr.msk.bf16.mxu0 %vm1064_vm0, %v1063_v0  ;;  %823 = vmatpush3.bf16.msra.mxu0 %v881_v50 }
 0x231   :  { %824 = vmatprep.subr.bf16.mxu0 %v1063_v0 }
 0x234   :  { %825 = vmatpush3.bf16.msra.mxu0 %v882_v51 }
 0x235   :  { %826 = vmatprep.subr.bf16.mxu0 %v1063_v0 }
 0x238   :  { %827 = vmatpush3.bf16.msra.mxu0 %v883_v52 }
 0x239   :  { %828 = vmatprep.subr.bf16.mxu0 %v1063_v0 }
 0x23c   :  { %829 = vmatpush3.bf16.msra.mxu0 %v884_v53 }
 0x23d   :  { %830 = vmatprep.subr.bf16.mxu0 %v1063_v0 }
 0x240   :  { %831 = vmatpush3.bf16.msra.mxu0 %v885_v54 }
 0x241   :  { %832 = vmatprep.subr.bf16.mxu0 %v1063_v0 }
 0x244   :  { %833 = vmatpush3.bf16.msra.mxu0 %v886_v55 }
 0x245   :  { %834 = vmatprep.subr.bf16.mxu0 %v1063_v0 }
 0x248   :  { %835 = vmatpush3.bf16.msra.mxu0 %v887_v3 }
 0x249   :  { %836 = vmatprep.subr.bf16.mxu0 %v1063_v0  ;;  %v706_v0 = vld [vmem:[%s1300_s10] ss:$0 sm:$0xff] }
 0x24c   :  { %837 = vmatpush3.bf16.msra.mxu0 %v888_v4 }
 0x302   :  { %v416_v57 = vpop.f32.mrb[4].mxu0 }
 0x303   :  { %v417_v58 = vadd.f32 %v688_v56, %v416_v57  ;;  %v800_v59 = vpop.f32.mrb[5].mxu0 }
 0x304   :  { %v419_v60 = vpop.f32.mrb[6].mxu0 }
 0x305   :  { %v420_v61 = vadd.f32 %v688_v56, %v419_v60  ;;  %v801_v62 = vpop.f32.mrb[7].mxu0  ;;  %v423_v63 = vmax.f32 %v417_v58, 0.0 }
 0x307   :  { %v424_v1 = vmax.f32 %v420_v61, 0.0 }
 0x309   :  { %v425_v2 = vpack.c.bf16 %v424_v1, %v423_v63 }
 0x30b   :  { %819 = vmatmul.mubr.bf16.vlgmr.msra.gmra.mrb[4].mxu1 %v425_v2 }
 0x3de   :  { %v531_v6 = vpop.f32.mrb[4].mxu1 }
 0x3df   :  { %v532_v7 = vadd.f32 %v697_v5, %v531_v6  ;;  %v820_v8 = vpop.f32.mrb[5].mxu1 }
 0x3e0   :  { %v534_v9 = vpop.f32.mrb[6].mxu1 }
 0x3e1   :  { %v535_v10 = vadd.f32 %v697_v5, %v534_v9  ;;  %v821_v11 = vpop.f32.mrb[7].mxu1  ;;  %v538_v12 = vmax.f32 %v532_v7, 0.0 }
 0x3e3   :  { %v539_v13 = vmax.f32 %v535_v10, 0.0 }
 0x3e5   :  { %v540_v14 = vpack.c.bf16 %v539_v13, %v538_v12 }
 0x3e7   :  { %839 = vmatmul.mubr.bf16.vlgmr.msra.gmra.mrb[8].mxu0 %v540_v14 }
 0x4ba   :  { %v646_v15 = vpop.f32.mrb[8].mxu0 }
 0x4bb   :  { %v647_v16 = vadd.f32 %v706_v0, %v646_v15  ;;  %v840_v17 = vpop.f32.mrb[9].mxu0 }
 0x4bc   :  { %v649_v18 = vpop.f32.mrb[10].mxu0 }
 0x4bd   :  { %653 = vst [vmem:[#allocation13] sm:$0xff] %v647_v16  ;;  %v650_v19 = vadd.f32 %v706_v0, %v649_v18  ;;  %v841_v20 = vpop.f32.mrb[11].mxu0 }
 0x4bf   :  { %654 = vst [vmem:[#allocation13 + $0x8] sm:$0xff] %v650_v19 }
 0x4c0   :  { %1032 = shalt.err (!%p1029_p10)
}
 0x4c1   :  { %s1033_s22 = scalar_lea.hbm %s1301_s11, 256 }
 0x4c2   :  { %p1034_p11 = scmp.ne.s32.totalorder %s1301_s11, %s1033_s22  ;;  %p1037_p12 = scmp.lt.u32.totalorder %s1033_s22, %s1301_s11 }
 0x4c4   :  { %p1039_p13 = pnand %p1037_p12, %p1034_p11 }
 0x4c6   :  { %1042 = shalt.err (!%p1039_p13)
}
 0x4c7   :  { %666 = dma.vmem_to_hbm [thread:$0]  %s661_s24, 256, %s1301_s11, [#allocation4], %s1058_s5, %s1058_s5, %s1059_s13  }
 0x4c8   :  { %1051 = dma.done.wait [#allocation4], 256  }
 0x4c9   :  { %1052 = vsyncadd [#allocation4], 4294967040 }
 0x4ca   :  { %670 = vsyncpa [#allocation3], 1 }
 0x4cb   :  { %671 = vsyncpa [#allocation6], 1 }
 0x4cc   :  { %672 = vsyncpa [#allocation9], 1 }
 0x4cd   :  { %673 = vsyncpa [#allocation12], 1 }
 0x4ce   :  { %674 = vsyncpa [#allocation4], 1 }

</bundles_post_ra>
